<compile_context>
chip_gen: v5e
topology: v5e:2x2
jax: 0.10.0
libtpu: 0.0.40
codegen_flags: <defaults>
</compile_context>

<pallas_src>
import functools

import jax
import jax.numpy as jnp
from jax.experimental import pallas as pl
from jax.experimental.pallas import tpu as pltpu


def _round_up(x, m):
    return ((x + m - 1) // m) * m


def _vmem_budget_bytes():
    try:
        cap = int(pltpu.get_tpu_info().vmem_capacity_bytes)
    except Exception:
        cap = 64 << 20  # conservative fallback: v7x per-TensorCore VMEM
    return int(0.75 * cap)


def _instance_norm_leaky_relu(y, inv_p, eps, slope):
    # InstanceNorm2d(affine=False, eps) over the flattened spatial axis (two-pass stats),
    # then LeakyReLU(slope). y: (TC, P) f32.
    mean = jnp.sum(y, axis=1, keepdims=True) * inv_p
    d = y - mean
    var = jnp.sum(d * d, axis=1, keepdims=True) * inv_p
    yn = d * jax.lax.rsqrt(var + eps)
    return jnp.where(yn >= 0.0, yn, slope * yn)


def _unet_down_kernel(p_ref, w_ref, o_ref, *, nk, inv_p, eps, slope):
    # p_ref: (1, TK, P)  bf16 patch slab for sample n, K-chunk k
    # w_ref: (TC, TK)    bf16 weight tile
    # o_ref: (1, TC, P)  f32 output block (resident across the K axis when nk > 1)
    if nk == 1:
        # Whole contraction in one step: no accumulator round-trip, fused epilogue.
        y = jnp.dot(w_ref[...], p_ref[0], preferred_element_type=jnp.float32)
        o_ref[0] = _instance_norm_leaky_relu(y, inv_p, eps, slope)
    else:
        k = pl.program_id(2)

        @pl.when(k == 0)
        def _init():
            o_ref[...] = jnp.zeros_like(o_ref)

        o_ref[0] += jnp.dot(w_ref[...], p_ref[0], preferred_element_type=jnp.float32)

        @pl.when(k == nk - 1)
        def _finalize():
            o_ref[0] = _instance_norm_leaky_relu(o_ref[0], inv_p, eps, slope)


def unet_down(x, weight, bias=None):
    """UNetDown forward (normalize=True, dropout=0.0).
    x: (N, Cin, H, W) f32; weight: (Cout, Cin, 4, 4). The conv bias is unused because a
    per-channel constant is exactly cancelled by the InstanceNorm mean subtraction."""
    # TODO(synk): normalize=False / dropout>0 module configs not implemented (bias would then
    # have to be added back and pltpu.prng_* used); this covers the module's default config.
    del bias
    N, C, H, W = x.shape
    Cout = weight.shape[0]
    Ho, Wo = H // 2, W // 2
    P = Ho * Wo
    K = C * 16

    # --- space-to-depth im2col (wrapper glue, bf16): pad=1, then split the padded image into
    #     its 2x2 phases, turning the 4x4/s2 conv into a 2x2/s1 conv -> 4x patch inflation. ---
    # TODO(synk): building the 4 taps in-kernel from the phase image (pl.ANY + manual DMA)
    # would cut the remaining 4x inflation to ~1x; kept wrapper-side for layout robustness.
    xp = jnp.pad(x, ((0, 0), (0, 0), (1, 1), (1, 1))).astype(jnp.bfloat16)
    z = xp.reshape(N, C, Ho + 1, 2, Wo + 1, 2).transpose(0, 1, 3, 5, 2, 4)
    #   z[n, c, br, bc, r, s] = xp[n, c, 2r+br, 2s+bc]; shape (N, C, 2, 2, Ho+1, Wo+1)
    taps = [z[:, :, :, :, a:a + Ho, d:d + Wo] for a in range(2) for d in range(2)]
    p = jnp.stack(taps, axis=4).reshape(N, K, P)          # K order: (c, br, bc, a, d)

    # weight[co, c, kh, kw] with kh = 2a+br, kw = 2d+bc  ->  (co, (c, br, bc, a, d))
    w_mat = (weight.reshape(Cout, C, 2, 2, 2, 2)
             .transpose(0, 1, 3, 5, 2, 4)
             .reshape(Cout, K).astype(jnp.bfloat16))

    # --- tiling (generation-aware VMEM budget) ---
    LANE, MINC = 128, 16
    budget = _vmem_budget_bytes()

    Cout_pad = _round_up(Cout, MINC)
    TC = Cout_pad if Cout_pad <= 256 else 256
    # Keep two parallel blocks for v7x megacore when N == 1 would otherwise leave a 1x1 grid.
    if N == 1 and _round_up(Cout, TC) == TC and TC % 32 == 0:
        TC //= 2
    Cout_pad = _round_up(Cout, TC)

    def fits(tc, tk):
        # double-buffered bf16 patches + bf16 weights + f32 output block, plus scratch slack
        est = 2 * tk * P * 2 + 2 * tc * tk * 2 + 2 * tc * P * 4 + (4 << 20)
        return est <= budget

    if fits(TC, K):
        TK = K                                           # single K step, full-extent block
    else:
        TK = _round_up(K, LANE)
        while TK > LANE and not fits(TC, TK):
            TK = _round_up(TK // 2, LANE)
        while TC > MINC and not fits(TC, TK):
            TC = max(MINC, (TC // 2) // MINC * MINC)
        Cout_pad = _round_up(Cout, TC)
        # TODO(synk): if it still does not fit (very large P on v7x) a P-tiled two-pass
        # InstanceNorm path is needed; current fallback just uses the smallest tiles.
    K_pad = _round_up(K, TK)

    if K_pad != K:
        p = jnp.pad(p, ((0, 0), (0, K_pad - K), (0, 0)))
    if Cout_pad != Cout or K_pad != K:
        w_mat = jnp.pad(w_mat, ((0, Cout_pad - Cout), (0, K_pad - K)))

    nk = K_pad // TK
    kernel = functools.partial(_unet_down_kernel, nk=nk,
                               inv_p=float(1.0 / P), eps=1e-5, slope=0.2)

    out = pl.pallas_call(
        kernel,
        out_shape=jax.ShapeDtypeStruct((N, Cout_pad, P), jnp.float32),
        grid_spec=pltpu.PrefetchScalarGridSpec(
            num_scalar_prefetch=0,
            grid=(N, Cout_pad // TC, nk),
            in_specs=[
                pl.BlockSpec((1, TK, P), lambda n, c, k: (n, k, 0)),
                pl.BlockSpec((TC, TK), lambda n, c, k: (c, k)),
            ],
            out_specs=pl.BlockSpec((1, TC, P), lambda n, c, k: (n, c, 0)),
        ),
        compiler_params=pltpu.CompilerParams(
            dimension_semantics=("parallel", "parallel", "arbitrary"),
            vmem_limit_bytes=budget),
    )(p, w_mat)

    # Padded channels (zero weights) normalize to zeros; slice only if padding was added.
    if Cout_pad != Cout:
        out = out[:, :Cout, :]
    return out.reshape(N, Cout, Ho, Wo)


if __name__ == "__main__":
    key = jax.random.PRNGKey(0)
    k_x, k_w, k_b = jax.random.split(key, 3)

    N, Cin, H, W = 2, 4, 16, 16
    Cout = 8

    x = jax.random.normal(k_x, (N, Cin, H, W), dtype=jnp.float32)
    # Deterministic synthetic parameters (Conv2d(in=4, out=8, kernel=4, stride=2, pad=1))
    weight = 0.1 * jax.random.normal(k_w, (Cout, Cin, 4, 4), dtype=jnp.float32)
    bias = 0.1 * jax.random.normal(k_b, (Cout,), dtype=jnp.float32)

    y = unet_down(x, weight, bias)
    jax.block_until_ready(y)
    assert y.shape == (N, Cout, H // 2, W // 2)
    # TODO(synk): Dropout (default 0.0) omitted; would need pltpu.prng_* if nonzero.
    print("KERNEL_OK")
</pallas_src>

<mosaic_0001>
module attributes {stable_mosaic.version = 11 : i64} {
  func.func @_unet_down_kernel(%arg0: i32, %arg1: i32, %arg2: i32, %arg3: memref<1x64x64xbf16, #tpu.memory_space<vmem>>, %arg4: memref<16x64xbf16, #tpu.memory_space<vmem>>, %arg5: memref<1x16x64xf32, #tpu.memory_space<vmem>>) attributes {dimension_semantics = [#tpu.dimension_semantics<parallel>, #tpu.dimension_semantics<parallel>, #tpu.dimension_semantics<arbitrary>], iteration_bounds = array<i64: 2, 1, 1>, scalar_prefetch = 0 : i64, scratch_operands = 0 : i64, tpu.core_type = #tpu.core_type<tc>, window_params = [{transform_indices = @transform_0, window_bounds = array<i64: 1, 64, 64>}, {transform_indices = @transform_1, window_bounds = array<i64: 16, 64>}, {transform_indices = @transform_2, window_bounds = array<i64: 1, 16, 64>}]} {
    %c0 = arith.constant 0 : index
    %c0_0 = arith.constant 0 : index
    %0 = vector.load %arg4[%c0, %c0_0] : memref<16x64xbf16, #tpu.memory_space<vmem>>, vector<16x64xbf16>
    %c0_1 = arith.constant 0 : index
    %c0_2 = arith.constant 0 : index
    %c0_3 = arith.constant 0 : index
    %1 = vector.load %arg3[%c0_1, %c0_2, %c0_3] : memref<1x64x64xbf16, #tpu.memory_space<vmem>>, vector<1x64x64xbf16>
    %2 = vector.shape_cast %1 : vector<1x64x64xbf16> to vector<64x64xbf16>
    %cst = arith.constant dense<0.000000e+00> : vector<16x64xf32>
    %3 = tpu.matmul %0, %2, %cst {dimension_numbers = #tpu.dot_dimension_numbers<[1], [0], [0], [1], [0, 0, 1, 1], [], []>} : vector<16x64xbf16>, vector<64x64xbf16>, vector<16x64xf32> -> vector<16x64xf32>
    %cst_4 = arith.constant dense<0.000000e+00> : vector<16xf32>
    %4 = vector.multi_reduction <add>, %3, %cst_4 [1] : vector<16x64xf32> to vector<16xf32>
    %5 = vector.shape_cast %4 : vector<16xf32> to vector<16x1xf32>
    %cst_5 = arith.constant 1.562500e-02 : f32
    %6 = vector.broadcast %cst_5 : f32 to vector<16x1xf32>
    %7 = arith.mulf %5, %6 : vector<16x1xf32>
    %8 = vector.broadcast %7 : vector<16x1xf32> to vector<16x64xf32>
    %9 = arith.subf %3, %8 : vector<16x64xf32>
    %10 = arith.mulf %9, %9 : vector<16x64xf32>
    %cst_6 = arith.constant dense<0.000000e+00> : vector<16xf32>
    %11 = vector.multi_reduction <add>, %10, %cst_6 [1] : vector<16x64xf32> to vector<16xf32>
    %12 = vector.shape_cast %11 : vector<16xf32> to vector<16x1xf32>
    %cst_7 = arith.constant 1.562500e-02 : f32
    %13 = vector.broadcast %cst_7 : f32 to vector<16x1xf32>
    %14 = arith.mulf %12, %13 : vector<16x1xf32>
    %cst_8 = arith.constant 9.99999974E-6 : f32
    %15 = vector.broadcast %cst_8 : f32 to vector<16x1xf32>
    %16 = arith.addf %14, %15 : vector<16x1xf32>
    %17 = math.rsqrt %16 : vector<16x1xf32>
    %18 = vector.broadcast %17 : vector<16x1xf32> to vector<16x64xf32>
    %19 = arith.mulf %9, %18 : vector<16x64xf32>
    %cst_9 = arith.constant 0.000000e+00 : f32
    %20 = vector.broadcast %cst_9 : f32 to vector<16x64xf32>
    %21 = arith.cmpf oge, %19, %20 : vector<16x64xf32>
    %cst_10 = arith.constant 2.000000e-01 : f32
    %22 = vector.broadcast %cst_10 : f32 to vector<16x64xf32>
    %23 = arith.mulf %22, %19 : vector<16x64xf32>
    %24 = arith.select %21, %19, %23 : vector<16x64xi1>, vector<16x64xf32>
    %c0_11 = arith.constant 0 : index
    %c0_12 = arith.constant 0 : index
    %c0_13 = arith.constant 0 : index
    %25 = vector.load %arg5[%c0_11, %c0_12, %c0_13] : memref<1x16x64xf32, #tpu.memory_space<vmem>>, vector<1x16x64xf32>
    %26 = vector.shape_cast %25 : vector<1x16x64xf32> to vector<16x64xf32>
    %27 = vector.shape_cast %24 : vector<16x64xf32> to vector<1x16x64xf32>
    tpu.vector_store %arg5[%c0_11, %c0_12, %c0_13], %27 {strides = array<i32>} : memref<1x16x64xf32, #tpu.memory_space<vmem>>, vector<1x16x64xf32>,
    return
  }
  func.func @transform_0(%arg0: i32, %arg1: i32, %arg2: i32) -> (i32, i32, i32) {
    %c0_i32 = arith.constant 0 : i32
    %c0_i32_0 = arith.constant 0 : i32
    return %arg0, %arg2, %c0_i32 : i32, i32, i32
  }
  func.func @transform_1(%arg0: i32, %arg1: i32, %arg2: i32) -> (i32, i32) {
    %c0_i32 = arith.constant 0 : i32
    return %arg1, %arg2 : i32, i32
  }
  func.func @transform_2(%arg0: i32, %arg1: i32, %arg2: i32) -> (i32, i32, i32) {
    %c0_i32 = arith.constant 0 : i32
    %c0_i32_0 = arith.constant 0 : i32
    return %arg0, %arg1, %c0_i32 : i32, i32, i32
  }
}

</mosaic_0001>

<bundles_post_ra>
// kernel: tpu_custom_call.1
= control target key start
LH: loop header
LB: loop body
LE: loop exit
PB: predicated region body
PF: predicated region fallthrough
CT: control target
= control target key end

     0   :  { %7 = vsyncpa [#allocation3], 0  ;;  %s909_s0 = inlined_call_operand.hbm [shape: bf16[2,64,64], index: 0, kind: input, shape index: {}]   ;;  %s910_s1 = inlined_call_operand.hbm [shape: bf16[16,64], index: 1, kind: input, shape index: {}]   ;;  %s911_s2 = inlined_call_operand.hbm [shape: f32[2,16,64], index: 2, kind: output, shape index: {}]  }
   0x1   :  { %9 = vsyncpa [#allocation3 + $0x1], 0 }
   0x2   :  { %10 = vsyncpa [#allocation6], 0 }
   0x3   :  { %11 = vsyncpa [#allocation4], 0 }
   0x4   :  { %13 = vsyncpa [#allocation4 + $0x1], 0  ;;  %s746_s9 = smov 0   ;;  %s748_s10 = smov 0  }
   0x5   :  { %s750_s11 = smov 0   ;;  %s752_s12 = smov 0  }
   0x6   :  { %s754_s13 = smov 0   ;;  %s756_s14 = smov 0  }
   0x7 LB: > { %s452_s15 = sadd.s32 4294967295, %s724_s14   ;;  %s453_s16 = sadd.s32 4294967294, %s724_s14   ;;  %s724_s14 = sphi %s756_s14, %s19_s14   ;;  %s720_s13 = sphi %s754_s13, %s923_s13   ;;  %s716_s12 = sphi %s752_s12, %s922_s12   ;;  %s712_s11 = sphi %s750_s11, %s921_s11   ;;  %s708_s10 = sphi %s748_s10, %s920_s10   ;;  %s704_s9 = sphi %s746_s9, %s919_s9  }
   0x8   : > { %p60_p0 = scmp.ne.s32.totalorder %s708_s10, %s704_s9  ;;  %p780_p1 = scmp.eq.s32.totalorder %s452_s15, 0 }
   0x9   : > { %p784_p2 = scmp.eq.s32.totalorder %s452_s15, 1  ;;  %p120_p3 = scmp.eq.s32.totalorder %s453_s16, 1 }
   0xa   : > { %p790_p4 = por %p780_p1, %p60_p0  ;;  %p454_p5 = scmp.ge.s32.totalorder %s724_s14, 1 }
   0xb   : > { %p795_p6 = por %p120_p3, %p60_p0  ;;  %p127_p7 = scmp.lt.s32.totalorder %s724_s14, 3 }
   0xc   : > { %s142_s23 = sshll.u32 %s910_s1, 4  ;;  %s726_s25 = smov [#allocation5]   ;;  %s143_s23 = int_to_ptr.hbm [resolvable:$true] %s142_s23 }
   0xd   : > { %p803_p8 = pnand %p454_p5, %p127_p7  ;;  %s144_s26 = sshll.u32 %s726_s25, 4  ;;  %s145_s26 = int_to_ptr.vmem [resolvable:$true] %s144_s26 }
   0xe   : > { %p456_p11 = scmp.ge.s32.totalorder %s724_s14, 2  ;;  %s727_s27 = smov 64  }
   0xf   : > { %p505_p9 = pneg %p803_p8  ;;  %s728_s28 = smov 4  }
  0x10   : > { %s38_s29 = sadd.s32 1, %s720_s13  ;;  %s47_s30 = sadd.s32 1, %s712_s11 }
  0x11   : > { %p506_p10 = pnand %p505_p9, %p780_p1  ;;  %p40_p12 = scmp.ge.s32.totalorder %s38_s29, 2 }
  0x12   : > { %p54_p13 = scmp.ne.s32.totalorder %s712_s11, %s708_s10  ;;  %p55_p0 = scmp.eq.s32.totalorder %s724_s14, 0 }
  0x13   : > { %508 = dma.hbm_to_vmem [thread:$0]  (!%p506_p10), %s143_s23, 128, %s145_s26, [#allocation6], %s727_s27, %s727_s27, %s728_s28  }
  0x14   : > { %s925_s29 = smov (%p40_p12, %s38_s29), 0  ;;  %p822_p3 = por %p55_p0, %p54_p13 }
  0x15   : > { %p828_p5 = por %p784_p2, %p54_p13  ;;  %s42_s5 = ssub.s32 %s720_s13, %s925_s29 }
  0x16   : > { %p518_p7 = scmp.lt.s32.totalorder %s724_s14, 2  ;;  %p45_p9 = scmp.eq.s32.totalorder %s42_s5, 0 }
  0x17   : > { %s158_s6 = sand.u32 1, %s712_s11   ;;  %s490_s15 = sshll.u32 %s720_s13, 5 }
  0x18   : > { %s457_s7 = sshll.u32 %s158_s6, 5  ;;  %s169_s22 = scalar_lea.hbm %s909_s0, %s490_s15 }
  0x19   : > { %s837_s8 = scalar_select %p45_p9, %s712_s11, %s47_s30  }
  0x1a   : > { %s162_s23 = scalar_lea.vmem [#allocation2], %s457_s7  ;;  %s170_s18 = sshll.u32 %s169_s22, 4  ;;  %s171_s18 = int_to_ptr.hbm [resolvable:$true] %s170_s18 }
  0x1b   : > { %s172_s25 = sshll.u32 %s162_s23, 4  ;;  %p510_p2 = pnand %p518_p7, %p822_p3  ;;  %s173_s25 = int_to_ptr.vmem [resolvable:$true] %s172_s25 }
  0x1c   : > { %s159_s26 = scalar_lea.sflag [#allocation3], %s158_s6  ;;  %184 = sbr.rel (%p803_p8) target bundleno = 457 (0x1c9), region = 28 }
  0x1d   : > { %512 = dma.hbm_to_vmem [thread:$0]  (!%p510_p2), %s171_s18, 512, %s173_s25, %s159_s26, %s727_s27, %s727_s27, %s728_s28  }
  0x1e   : > { %s851_s30 = sand.u32 (!%p803_p8), 1, %s708_s10  }
  0x1f   : > { %s461_s5 = sshll.u32 (!%p803_p8), %s851_s30, 5  ;;  %s187_s7 = scalar_lea.sflag (!%p803_p8), [#allocation3], %s851_s30 }
  0x20   : > { %s190_s15 = scalar_lea.vmem (!%p803_p8), [#allocation2], %s461_s5 }
  0x21   : > { %691 = dma.done.wait (%p790_p4), %s187_s7, 512  }
  0x22   : > { %693 = vsyncadd (%p790_p4), %s187_s7, 4294966784 }
  0x23   : > { %695 = dma.done.wait (%p780_p1), [#allocation6], 128  }
  0x24   : > { %697 = vsyncadd (%p780_p1), [#allocation6], 4294967168  ;;  %v495_v0 = vld [vmem:[%s190_s15 + $0x18] sm:$0xff]  ;;  %v494_v1 = vld [vmem:[%s190_s15 + $0x10] sm:$0xff]  ;;  %vm260_vm0 = vcmask 523264   ;;  %s463_s17 = sshll.u32 %s851_s30, 4 }
  0x25   : > { %268 = vmatpush.bf16.msra.mxu0 %v495_v0  ;;  %v493_v2 = vld [vmem:[%s190_s15 + $0x8] sm:$0xff]  ;;  %v492_v3 = vld [vmem:[%s190_s15] sm:$0xff]  ;;  %s496_s19 = sshll.u32 %s716_s12, 4  ;;  %s216_s3 = scalar_lea.vmem [#allocation7], %s463_s17 }
  0x26   : > { %v491_v4 = vld [vmem:[#allocation5] sm:$0xff]  ;;  %s344_s28 = scalar_lea.hbm %s911_s2, %s496_s19  ;;  %s345_s6 = sshll.u32 %s216_s3, 4  ;;  %s346_s6 = int_to_ptr.vmem [resolvable:$true] %s345_s6 }
  0x27   : > { %s347_s12 = sshll.u32 %s344_s28, 4  ;;  %s331_s16 = scalar_lea.sflag [#allocation4], %s851_s30  ;;  %s348_s12 = int_to_ptr.hbm [resolvable:$true] %s347_s12 }
  0x28   : > { %s652_s21 = sshra.s32 %s348_s12, 4  ;;  %s658_s18 = scalar_lea.hbm %s911_s2, 32  ;;  %s653_s21 = int_to_ptr.hbm [resolvable:$true] %s652_s21 }
  0x29   : > { %269 = vmatpush.bf16.msra.mxu0 %v494_v1  ;;  %s654_s22 = scalar_lea.hbm %s653_s21, 16  ;;  %p659_p10 = scmp.lt.s32.totalorder %s653_s21, %s911_s2 }
  0x2a   : > { %p655_p1 = scmp.ne.s32.totalorder %s653_s21, %s654_s22  ;;  %p660_p12 = scmp.lt.s32.totalorder %s658_s18, %s654_s22 }
  0x2c   : > { %p656_p4 = pnand %p655_p1, %p828_p5  ;;  %p661_p13 = por %p660_p12, %p659_p10 }
  0x2d   : > { %270 = vmatpush.bf16.msra.mxu0 %v493_v2 }
  0x2e   : > { %p657_p8 = pneg %p656_p4 }
  0x30   : > { %p662_p0 = pnand %p661_p13, %p657_p8 }
  0x31   : > { %271 = vmatpush.bf16.msra.mxu0 %v492_v3 }
  0x34   : > { %484 = vmatmul.msk.bf16.vlgmr.msra.gmra.mxu0 %vm260_vm0, %v491_v4 }
  0xb1   : > { %v273_v5 = vpop.f32.mrf.mxu0 }
  0xb2   : > { %v278_v6 = vsel %vm260_vm0, %v273_v5, 0.0 }
  0xb3   : > { %279 = vadd.xlane.f32.xlu0 %v278_v6 }
  0xb9   : > { %v275_v7 = vpop.f32.mrf.mxu0 }
  0xba   : > { %v281_v8 = vsel %vm260_vm0, %v275_v7, 0.0 }
  0xbb   : > { %282 = vadd.xlane.f32.xlu0 %v281_v8 }
 0x126   : > { %v280_v9 = vpop.xlane.xlu0 %279 }
 0x127   : > { %v284_v10 = vmul.f32 0.015625, %v280_v9 }
 0x129   : > { %v286_v11 = vsub.f32 %v273_v5, %v284_v10 }
 0x12b   : > { %v288_v12 = vmul.f32 %v286_v11, %v286_v11 }
 0x12d   : > { %v290_v13 = vsel %vm260_vm0, %v288_v12, 0.0 }
 0x12e   : > { %291 = vadd.xlane.f32.xlu1 %v290_v13  ;;  %v283_v14 = vpop.xlane.xlu0 %282 }
 0x12f   : > { %v285_v15 = vmul.f32 0.015625, %v283_v14 }
 0x131   : > { %v287_v16 = vsub.f32 %v275_v7, %v285_v15 }
 0x133   : > { %v289_v17 = vmul.f32 %v287_v16, %v287_v16 }
 0x135   : > { %v293_v18 = vsel %vm260_vm0, %v289_v17, 0.0 }
 0x136   : > { %294 = vadd.xlane.f32.xlu1 %v293_v18 }
 0x1a1   : > { %v292_v19 = vpop.xlane.xlu1 %291 }
 0x1a2   : > { %v296_v20 = vmul.f32 0.015625, %v292_v19 }
 0x1a4   : > { %v298_v21 = vadd.f32 1e-05, %v296_v20 }
 0x1a6   : > { %574 = vrsqrt.f32 %v298_v21  ;;  %vm306_vm2 = vweird.f32 %v298_v21 }
 0x1a9   : > { %v295_v22 = vpop.xlane.xlu1 %294 }
 0x1aa   : > { %v297_v23 = vmul.f32 0.015625, %v295_v22 }
 0x1ac   : > { %v575_v24 = vpop.eup %574  ;;  %v299_v25 = vadd.f32 1e-05, %v297_v23 }
 0x1ad   : > { %v301_v26 = vmul.f32 %v575_v24, %v298_v21  ;;  %vm307_vm1 = vweird.f32 %v575_v24 }
 0x1ae   : > { %576 = vrsqrt.f32 %v299_v25  ;;  %vm308_vm3 = vmor %vm306_vm2, %vm307_vm1  ;;  %vm316_vm6 = vweird.f32 %v299_v25 }
 0x1af   : > { %v302_v27 = vmul.f32 %v575_v24, %v301_v26 }
 0x1b1   : > { %v303_v28 = vmul.f32 0.5, %v302_v27 }
 0x1b3   : > { %v304_v29 = vsub.f32 1.5, %v303_v28 }
 0x1b4   : > { %v577_v30 = vpop.eup %576 }
 0x1b5   : > { %v305_v31 = vmul.f32 %v575_v24, %v304_v29  ;;  %v311_v32 = vmul.f32 %v577_v30, %v299_v25  ;;  %vm317_vm5 = vweird.f32 %v577_v30 }
 0x1b6   : > { %vm318_vm7 = vmor %vm316_vm6, %vm317_vm5 }
 0x1b7   : > { %v309_v33 = vsel %vm308_vm3, %v575_v24, %v305_v31  ;;  %v312_v34 = vmul.f32 %v577_v30, %v311_v32 }
 0x1b8   : > { %v320_v35 = vmul.f32 %v309_v33, %v286_v11 }
 0x1b9   : > { %v313_v36 = vmul.f32 0.5, %v312_v34 }
 0x1ba   : > { %vm322_vm4 = vcmp.ge.f32.partialorder %v320_v35, 0.0  ;;  %v324_v37 = vmul.f32 0.2, %v320_v35 }
 0x1bb   : > { %v314_v38 = vsub.f32 1.5, %v313_v36 }
 0x1bc   : > { %v326_v39 = vsel %vm322_vm4, %v320_v35, %v324_v37 }
 0x1bd   : > { %v315_v40 = vmul.f32 %v577_v30, %v314_v38  ;;  %328 = vst.msk [vmem:[%s216_s3] sm:$0xff] %vm260_vm0, %v326_v39 }
 0x1bf   : > { %v319_v41 = vsel %vm318_vm7, %v577_v30, %v315_v40 }
 0x1c0   : > { %v321_v42 = vmul.f32 %v319_v41, %v287_v16 }
 0x1c2   : > { %vm323_vm8 = vcmp.ge.f32.partialorder %v321_v42, 0.0  ;;  %v325_v43 = vmul.f32 0.2, %v321_v42 }
 0x1c4   : > { %v327_v44 = vsel %vm323_vm8, %v321_v42, %v325_v43 }
 0x1c5   : > { %329 = vst.msk [vmem:[%s216_s3 + $0x8] sm:$0xff] %vm260_vm0, %v327_v44 }
 0x1c6   : > { %665 = shalt.err (!%p662_p0)
}
 0x1c7   : > { %s729_s30 = smov 128   ;;  %s730_s7 = smov 8  }
 0x1c8   : > { %503 = dma.vmem_to_hbm [thread:$0]  (%p828_p5), %s346_s6, 256, %s348_s12, %s331_s16, %s729_s30, %s729_s30, %s730_s7  }
 0x1c9 PF: > { %s362_s15 = sand.u32 1, %s704_s9   ;;  %p514_p3 = pnand %p456_p11, %p795_p6 }
 0x1ca   : > { %s363_s17 = scalar_lea.sflag [#allocation4], %s362_s15 }
 0x1cb   : > { %p515_p7 = pneg %p514_p3 }
 0x1cd   : > { %699 = dma.done.wait (%p515_p7), %s363_s17, 256  }
 0x1ce   : > { %701 = vsyncadd (%p515_p7), %s363_s17, 4294967040  ;;  %s19_s14 = sadd.s32 1, %s724_s14   ;;  %s919_s9 = smov %s708_s10 }
 0x1cf   : > { %p16_p9 = scmp.ge.s32.totalorder %s19_s14, 4   ;;  %s920_s10 = smov %s712_s11 }
 0x1d0   : > { %s921_s11 = smov %s837_s8  ;;  %s922_s12 = smov %s720_s13 }
 0x1d1   : > { %s923_s13 = smov %s925_s29  ;;  %18 = sbr.rel (!%p16_p9) target bundleno = 7 (0x7), region = 78 }
 0x1d6   :  { %369 = vsyncpa [#allocation3], 1 }
 0x1d7   :  { %371 = vsyncpa [#allocation3 + $0x1], 1 }
 0x1d8   :  { %372 = vsyncpa [#allocation6], 1 }
 0x1d9   :  { %373 = vsyncpa [#allocation4], 1 }
 0x1da   :  { %375 = vsyncpa [#allocation4 + $0x1], 1 }

</bundles_post_ra>
